<compile_context>
chip_gen: v5e
topology: v5e:2x2
jax: 0.10.0
libtpu: 0.0.40
codegen_flags: <defaults>
</compile_context>

<pallas_src>
import functools

import jax
import jax.numpy as jnp
from jax.experimental import pallas as pl
from jax.experimental.pallas import tpu as pltpu

HIDDEN = 32          # hidden_size
NUM_HEADS = 4
HEAD_DIM = HIDDEN // NUM_HEADS
LN_EPS = 1e-5        # nn.LayerNorm default eps
LANES = 128


def _round8(n):
    return ((n + 7) // 8) * 8


def slab_layout(obs_dim):
    """Sublane offsets (all multiples of 8) of each parameter in the fused slab."""
    H = HIDDEN
    off, r = {}, 0
    for name, rows in (("w_in", obs_dim), ("w_q", H), ("w_kv", H), ("w_o", H),
                       ("w_1", H), ("w_2", 2 * H), ("w_3", H),
                       ("g", H), ("g_t", NUM_HEADS), ("bias", 9)):
        off[name] = r
        r += _round8(rows)
    off["rows"] = r
    return off


def attention_value_kernel(x_ref, p_ref, out_ref, *, batch, seq, obs_dim):
    H, NH, hd = HIDDEN, NUM_HEADS, HEAD_DIM
    B, S = batch, seq
    L = slab_layout(obs_dim)
    f32 = jnp.float32

    def w(name, rows, lanes):
        r = L[name]
        return p_ref[r:r + rows, 0:lanes]

    w_in = w("w_in", obs_dim, H)
    w_q = w("w_q", H, H)
    w_kv = w("w_kv", H, 2 * H)
    w_o = w("w_o", H, H)
    w_1 = w("w_1", H, 2 * H)
    w_2 = w("w_2", 2 * H, H)
    w_3 = w("w_3", H, LANES)            # lanes 1.. are zero -> lane-dense output
    g = w("g", H, NH)                   # one-hot head grouping (H, NH)
    g_t = w("g_t", NH, H)               # its transpose (NH, H)

    bias = p_ref[L["bias"]:L["bias"] + 16, :]       # one aligned load; slice rows
    b_in, b_q = bias[0:1, 0:H], bias[1:2, 0:H]
    b_kv, b_o = bias[2:3, 0:2 * H], bias[3:4, 0:H]
    ln_g, ln_b = bias[4:5, 0:H], bias[5:6, 0:H]
    b_1, b_2 = bias[6:7, 0:2 * H], bias[7:8, 0:H]
    b_3 = bias[8:9, :]                              # (1, 128), lanes 1.. are zero

    # --- projections over all B*S rows (two matmuls total) -------------------
    x = x_ref[...]                                               # (B*S, obs_dim)
    h = jnp.dot(x, w_in, preferred_element_type=f32) + b_in      # (B*S, H)
    kv = jnp.dot(h, w_kv, preferred_element_type=f32) + b_kv     # (B*S, 2H)
    k, v = kv[:, 0:H], kv[:, H:2 * H]

    # --- last-timestep rows (only row S-1 of each batch is consumed) ---------
    h_last = jnp.concatenate(
        [h[b * S + S - 1:b * S + S, :] for b in range(B)], axis=0)        # (B, H)
    q_last = jnp.dot(h_last, w_q, preferred_element_type=f32) + b_q       # (B, H)
    q_last = q_last * (1.0 / hd ** 0.5)

    # --- attention batched over (batch x head): no per-head loop -------------
    # scores[b*S+s, n] = <q_last[b, head n], k[b*S+s, head n]> / sqrt(hd)
    q_exp = jnp.concatenate(
        [jnp.broadcast_to(q_last[b:b + 1, :], (S, H)) for b in range(B)],
        axis=0)                                                  # (B*S, H)
    scores = jnp.dot(k * q_exp, g, preferred_element_type=f32)   # (B*S, NH)
    s_r = scores.reshape(B, S, NH)
    m = jnp.max(s_r, axis=1, keepdims=True)                      # (B, 1, NH)
    e = jnp.exp(s_r - m)                                         # ONE exp, whole block
    den = jnp.sum(e, axis=1, keepdims=True)                      # (B, 1, NH)
    p = (e / den).reshape(B * S, NH)                             # softmax over S
    p_wide = jnp.dot(p, g_t, preferred_element_type=f32)         # (B*S, H): weight per lane's head
    ctx = jnp.sum((p_wide * v).reshape(B, S, H), axis=1)         # (B, H) heads already concat

    # --- out-projection + residual + LayerNorm, once on the (B, H) slab ------
    attended = jnp.dot(ctx, w_o, preferred_element_type=f32) + b_o
    y = h_last + attended
    mean = jnp.mean(y, axis=-1, keepdims=True)
    var = jnp.mean((y - mean) ** 2, axis=-1, keepdims=True)
    y = (y - mean) * jax.lax.rsqrt(var + LN_EPS) * ln_g + ln_b

    # --- output_mlp: Linear(H,2H)+ReLU -> Linear(2H,H)+ReLU -> Linear(H,1) ---
    z = jnp.maximum(jnp.dot(y, w_1, preferred_element_type=f32) + b_1, 0.0)
    z = jnp.maximum(jnp.dot(z, w_2, preferred_element_type=f32) + b_2, 0.0)
    z = jnp.dot(z, w_3, preferred_element_type=f32) + b_3        # (B, 128); lane 0 = value

    out_ref[...] = z                                             # lane-dense full-block store


@jax.jit
def attention_value_forward(x, slab):
    """x: (B, S, obs_dim) float32 -> value: (B,) float32 (new_hidden is None)."""
    B, S, obs_dim = x.shape
    x2 = x.reshape(B * S, obs_dim)
    kernel = functools.partial(attention_value_kernel, batch=B, seq=S, obs_dim=obs_dim)
    out = pl.pallas_call(
        kernel,
        out_shape=jax.ShapeDtypeStruct((B, LANES), jnp.float32),
        grid=(1,),
        in_specs=[pl.BlockSpec((B * S, obs_dim), lambda i: (0, 0)),
                  pl.BlockSpec(slab.shape, lambda i: (0, 0))],
        out_specs=pl.BlockSpec((B, LANES), lambda i: (0, 0)),
        compiler_params=pltpu.CompilerParams(dimension_semantics=("arbitrary",)),
    )(x2, slab)
    return out[:, 0]


def make_params(key, obs_dim, hidden=HIDDEN):
    """Deterministic synthetic parameters (PyTorch-Linear-style uniform init)."""
    H = hidden
    keys = jax.random.split(key, 8)

    def lin(k, fan_in, fan_out):
        bound = 1.0 / (fan_in ** 0.5)
        kw, kb = jax.random.split(k)
        W = jax.random.uniform(kw, (fan_in, fan_out), jnp.float32, -bound, bound)
        b = jax.random.uniform(kb, (1, fan_out), jnp.float32, -bound, bound)
        return W, b

    w_in, b_in = lin(keys[0], obs_dim, H)
    wq, bq = lin(keys[1], H, H)
    wk, bk = lin(keys[2], H, H)
    wv, bv = lin(keys[3], H, H)
    wo, bo = lin(keys[4], H, H)
    ln_g = jnp.ones((1, H), jnp.float32)     # LayerNorm default init
    ln_b = jnp.zeros((1, H), jnp.float32)
    w1, b1 = lin(keys[5], H, 2 * H)
    w2, b2 = lin(keys[6], 2 * H, H)
    w3, b3 = lin(keys[7], H, 1)
    return [w_in, b_in, wq, bq, wk, bk, wv, bv, wo, bo,
            ln_g, ln_b, w1, b1, w2, b2, w3, b3]


def fuse_params(params, obs_dim):
    """Pack every weight/bias (+ head one-hots) into ONE lane-padded (R,128) slab."""
    (w_in, b_in, wq, bq, wk, bk, wv, bv, wo, bo,
     ln_g, ln_b, w1, b1, w2, b2, w3, b3) = params
    H, NH, hd = HIDDEN, NUM_HEADS, HEAD_DIM
    L = slab_layout(obs_dim)

    w_kv = jnp.concatenate([wk, wv], axis=1)          # (H, 2H)
    b_kv = jnp.concatenate([bk, bv], axis=1)          # (1, 2H)
    lane = jnp.arange(H)[:, None]
    head = jnp.arange(NH)[None, :]
    g = (lane // hd == head).astype(jnp.float32)      # (H, NH) one-hot head grouping
    g_t = g.T                                         # (NH, H)

    slab = jnp.zeros((L["rows"], LANES), jnp.float32)

    def put(s, name, mat):
        r = L[name]
        return s.at[r:r + mat.shape[0], :mat.shape[1]].set(mat)

    for name, mat in (("w_in", w_in), ("w_q", wq), ("w_kv", w_kv), ("w_o", wo),
                      ("w_1", w1), ("w_2", w2), ("w_3", w3), ("g", g), ("g_t", g_t)):
        slab = put(slab, name, mat)

    br = L["bias"]
    for i, vec in enumerate((b_in, bq, b_kv, bo, ln_g, ln_b, b1, b2, b3)):
        slab = slab.at[br + i, :vec.shape[1]].set(vec[0])
    return slab


def reference_forward(x, params):
    """Pure-JAX reference mirroring the PyTorch module semantics (eval mode)."""
    (w_in, b_in, wq, bq, wk, bk, wv, bv, wo, bo,
     ln_g, ln_b, w1, b1, w2, b2, w3, b3) = params
    h = x @ w_in + b_in
    B, S, H = h.shape

    def split_heads(t):
        return t.reshape(B, S, NUM_HEADS, HEAD_DIM).transpose(0, 2, 1, 3)

    q = split_heads(h @ wq + bq)
    k = split_heads(h @ wk + bk)
    v = split_heads(h @ wv + bv)
    scores = (q @ jnp.swapaxes(k, -1, -2)) / (HEAD_DIM ** 0.5)
    p = jax.nn.softmax(scores, axis=-1)
    o = (p @ v).transpose(0, 2, 1, 3).reshape(B, S, H)
    attended = o @ wo + bo
    y = h + attended
    mean = y.mean(-1, keepdims=True)
    var = ((y - mean) ** 2).mean(-1, keepdims=True)
    y = (y - mean) / jnp.sqrt(var + LN_EPS) * ln_g + ln_b
    last = y[:, -1, :]
    z = jnp.maximum(last @ w1 + b1, 0.0)
    z = jnp.maximum(z @ w2 + b2, 0.0)
    z = z @ w3 + b3
    return z[:, 0]


if __name__ == "__main__":
    B, S, OBS_DIM = 2, 8, 16

    key = jax.random.PRNGKey(0)
    kx, kp = jax.random.split(key)
    x = jax.random.normal(kx, (B, S, OBS_DIM), jnp.float32)
    params = make_params(kp, OBS_DIM, HIDDEN)
    slab = fuse_params(params, OBS_DIM)

    out = attention_value_forward(x, slab)
    out = jax.block_until_ready(out)

    with jax.default_matmul_precision("highest"):
        ref = jax.jit(reference_forward)(x, params)
        ref = jax.block_until_ready(ref)

    assert out.shape == (B,)
    # Tolerance accommodates TPU reduced-precision fp32 MXU passes in the
    # kernel vs the highest-precision reference; semantic errors are O(1).
    assert jnp.allclose(out, ref, rtol=2e-2, atol=2e-2), (out, ref)

    print("KERNEL_OK")
</pallas_src>

<mosaic_0001>
module attributes {stable_mosaic.version = 11 : i64} {
  func.func @attention_value_kernel(%arg0: i32, %arg1: memref<16x16xf32, #tpu.memory_space<vmem>>, %arg2: memref<296x128xf32, #tpu.memory_space<vmem>>, %arg3: memref<2x128xf32, #tpu.memory_space<vmem>>) attributes {dimension_semantics = [#tpu.dimension_semantics<arbitrary>], iteration_bounds = array<i64: 1>, scalar_prefetch = 0 : i64, scratch_operands = 0 : i64, tpu.core_type = #tpu.core_type<tc>, window_params = [{pipeline_mode = #tpu.pipeline_mode<synchronous>, transform_indices = @transform_0, window_bounds = array<i64: 16, 16>}, {pipeline_mode = #tpu.pipeline_mode<synchronous>, transform_indices = @transform_1, window_bounds = array<i64: 296, 128>}, {pipeline_mode = #tpu.pipeline_mode<synchronous>, transform_indices = @transform_2, window_bounds = array<i64: 2, 128>}]} {
    %c0 = arith.constant 0 : index
    %c0_0 = arith.constant 0 : index
    %0 = vector.load %arg2[%c0, %c0_0] : memref<296x128xf32, #tpu.memory_space<vmem>>, vector<16x32xf32>
    %c16 = arith.constant 16 : index
    %c0_1 = arith.constant 0 : index
    %1 = vector.load %arg2[%c16, %c0_1] : memref<296x128xf32, #tpu.memory_space<vmem>>, vector<32x32xf32>
    %c48 = arith.constant 48 : index
    %c0_2 = arith.constant 0 : index
    %2 = vector.load %arg2[%c48, %c0_2] : memref<296x128xf32, #tpu.memory_space<vmem>>, vector<32x64xf32>
    %c80 = arith.constant 80 : index
    %c0_3 = arith.constant 0 : index
    %3 = vector.load %arg2[%c80, %c0_3] : memref<296x128xf32, #tpu.memory_space<vmem>>, vector<32x32xf32>
    %c112 = arith.constant 112 : index
    %c0_4 = arith.constant 0 : index
    %4 = vector.load %arg2[%c112, %c0_4] : memref<296x128xf32, #tpu.memory_space<vmem>>, vector<32x64xf32>
    %c144 = arith.constant 144 : index
    %c0_5 = arith.constant 0 : index
    %5 = vector.load %arg2[%c144, %c0_5] : memref<296x128xf32, #tpu.memory_space<vmem>>, vector<64x32xf32>
    %c208 = arith.constant 208 : index
    %c0_6 = arith.constant 0 : index
    %6 = vector.load %arg2[%c208, %c0_6] : memref<296x128xf32, #tpu.memory_space<vmem>>, vector<32x128xf32>
    %c240 = arith.constant 240 : index
    %c0_7 = arith.constant 0 : index
    %7 = vector.load %arg2[%c240, %c0_7] : memref<296x128xf32, #tpu.memory_space<vmem>>, vector<32x4xf32>
    %c272 = arith.constant 272 : index
    %c0_8 = arith.constant 0 : index
    %8 = vector.load %arg2[%c272, %c0_8] : memref<296x128xf32, #tpu.memory_space<vmem>>, vector<4x32xf32>
    %c280 = arith.constant 280 : index
    %c0_9 = arith.constant 0 : index
    %9 = vector.load %arg2[%c280, %c0_9] : memref<296x128xf32, #tpu.memory_space<vmem>>, vector<16x128xf32>
    %10 = vector.extract_strided_slice %9 {offsets = [0, 0], sizes = [1, 32], strides = [1, 1]} : vector<16x128xf32> to vector<1x32xf32>
    %11 = vector.extract_strided_slice %9 {offsets = [1, 0], sizes = [1, 32], strides = [1, 1]} : vector<16x128xf32> to vector<1x32xf32>
    %12 = vector.extract_strided_slice %9 {offsets = [2, 0], sizes = [1, 64], strides = [1, 1]} : vector<16x128xf32> to vector<1x64xf32>
    %13 = vector.extract_strided_slice %9 {offsets = [3, 0], sizes = [1, 32], strides = [1, 1]} : vector<16x128xf32> to vector<1x32xf32>
    %14 = vector.extract_strided_slice %9 {offsets = [4, 0], sizes = [1, 32], strides = [1, 1]} : vector<16x128xf32> to vector<1x32xf32>
    %15 = vector.extract_strided_slice %9 {offsets = [5, 0], sizes = [1, 32], strides = [1, 1]} : vector<16x128xf32> to vector<1x32xf32>
    %16 = vector.extract_strided_slice %9 {offsets = [6, 0], sizes = [1, 64], strides = [1, 1]} : vector<16x128xf32> to vector<1x64xf32>
    %17 = vector.extract_strided_slice %9 {offsets = [7, 0], sizes = [1, 32], strides = [1, 1]} : vector<16x128xf32> to vector<1x32xf32>
    %18 = vector.extract_strided_slice %9 {offsets = [8, 0], sizes = [1, 128], strides = [1, 1]} : vector<16x128xf32> to vector<1x128xf32>
    %c0_10 = arith.constant 0 : index
    %c0_11 = arith.constant 0 : index
    %19 = vector.load %arg1[%c0_10, %c0_11] : memref<16x16xf32, #tpu.memory_space<vmem>>, vector<16x16xf32>
    %cst = arith.constant dense<0.000000e+00> : vector<16x32xf32>
    %20 = tpu.matmul %19, %0, %cst {dimension_numbers = #tpu.dot_dimension_numbers<[1], [0], [0], [1], [0, 0, 1, 1], [], []>} : vector<16x16xf32>, vector<16x32xf32>, vector<16x32xf32> -> vector<16x32xf32>
    %21 = vector.broadcast %10 : vector<1x32xf32> to vector<16x32xf32>
    %22 = arith.addf %20, %21 : vector<16x32xf32>
    %cst_12 = arith.constant dense<0.000000e+00> : vector<16x64xf32>
    %23 = tpu.matmul %22, %2, %cst_12 {dimension_numbers = #tpu.dot_dimension_numbers<[1], [0], [0], [1], [0, 0, 1, 1], [], []>} : vector<16x32xf32>, vector<32x64xf32>, vector<16x64xf32> -> vector<16x64xf32>
    %24 = vector.broadcast %12 : vector<1x64xf32> to vector<16x64xf32>
    %25 = arith.addf %23, %24 : vector<16x64xf32>
    %26 = vector.extract_strided_slice %25 {offsets = [0, 0], sizes = [16, 32], strides = [1, 1]} : vector<16x64xf32> to vector<16x32xf32>
    %27 = vector.extract_strided_slice %25 {offsets = [0, 32], sizes = [16, 32], strides = [1, 1]} : vector<16x64xf32> to vector<16x32xf32>
    %28 = vector.extract_strided_slice %22 {offsets = [7, 0], sizes = [1, 32], strides = [1, 1]} : vector<16x32xf32> to vector<1x32xf32>
    %29 = vector.extract_strided_slice %22 {offsets = [15, 0], sizes = [1, 32], strides = [1, 1]} : vector<16x32xf32> to vector<1x32xf32>
    %30 = tpu.concatenate %28, %29 in 0 : vector<1x32xf32>, vector<1x32xf32> -> vector<2x32xf32>
    %cst_13 = arith.constant dense<0.000000e+00> : vector<2x32xf32>
    %31 = tpu.matmul %30, %1, %cst_13 {dimension_numbers = #tpu.dot_dimension_numbers<[1], [0], [0], [1], [0, 0, 1, 1], [], []>} : vector<2x32xf32>, vector<32x32xf32>, vector<2x32xf32> -> vector<2x32xf32>
    %32 = vector.broadcast %11 : vector<1x32xf32> to vector<2x32xf32>
    %33 = arith.addf %31, %32 : vector<2x32xf32>
    %cst_14 = arith.constant 0.353553385 : f32
    %34 = vector.broadcast %cst_14 : f32 to vector<2x32xf32>
    %35 = arith.mulf %33, %34 : vector<2x32xf32>
    %36 = vector.extract_strided_slice %35 {offsets = [0, 0], sizes = [1, 32], strides = [1, 1]} : vector<2x32xf32> to vector<1x32xf32>
    %37 = vector.shape_cast %36 : vector<1x32xf32> to vector<1x32xf32>
    %38 = vector.broadcast %37 : vector<1x32xf32> to vector<8x32xf32>
    %39 = vector.extract_strided_slice %35 {offsets = [1, 0], sizes = [1, 32], strides = [1, 1]} : vector<2x32xf32> to vector<1x32xf32>
    %40 = vector.shape_cast %39 : vector<1x32xf32> to vector<1x32xf32>
    %41 = vector.broadcast %40 : vector<1x32xf32> to vector<8x32xf32>
    %42 = tpu.concatenate %38, %41 in 0 : vector<8x32xf32>, vector<8x32xf32> -> vector<16x32xf32>
    %43 = arith.mulf %26, %42 : vector<16x32xf32>
    %cst_15 = arith.constant dense<0.000000e+00> : vector<16x4xf32>
    %44 = tpu.matmul %43, %7, %cst_15 {dimension_numbers = #tpu.dot_dimension_numbers<[1], [0], [0], [1], [0, 0, 1, 1], [], []>} : vector<16x32xf32>, vector<32x4xf32>, vector<16x4xf32> -> vector<16x4xf32>
    %45 = vector.shape_cast %44 : vector<16x4xf32> to vector<2x8x4xf32>
    %cst_16 = arith.constant dense<0xFF800000> : vector<2x4xf32>
    %46 = vector.multi_reduction <maximumf>, %45, %cst_16 [1] : vector<2x8x4xf32> to vector<2x4xf32>
    %47 = vector.shape_cast %46 : vector<2x4xf32> to vector<2x1x4xf32>
    %48 = vector.broadcast %47 : vector<2x1x4xf32> to vector<2x8x4xf32>
    %49 = arith.subf %45, %48 : vector<2x8x4xf32>
    %50 = math.exp %49 : vector<2x8x4xf32>
    %cst_17 = arith.constant dense<0.000000e+00> : vector<2x4xf32>
    %51 = vector.multi_reduction <add>, %50, %cst_17 [1] : vector<2x8x4xf32> to vector<2x4xf32>
    %52 = vector.shape_cast %51 : vector<2x4xf32> to vector<2x1x4xf32>
    %53 = vector.broadcast %52 : vector<2x1x4xf32> to vector<2x8x4xf32>
    %54 = arith.divf %50, %53 : vector<2x8x4xf32>
    %55 = vector.shape_cast %54 : vector<2x8x4xf32> to vector<16x4xf32>
    %cst_18 = arith.constant dense<0.000000e+00> : vector<16x32xf32>
    %56 = tpu.matmul %55, %8, %cst_18 {dimension_numbers = #tpu.dot_dimension_numbers<[1], [0], [0], [1], [0, 0, 1, 1], [], []>} : vector<16x4xf32>, vector<4x32xf32>, vector<16x32xf32> -> vector<16x32xf32>
    %57 = arith.mulf %56, %27 : vector<16x32xf32>
    %58 = vector.shape_cast %57 : vector<16x32xf32> to vector<2x8x32xf32>
    %cst_19 = arith.constant dense<0.000000e+00> : vector<2x32xf32>
    %59 = vector.multi_reduction <add>, %58, %cst_19 [1] : vector<2x8x32xf32> to vector<2x32xf32>
    %cst_20 = arith.constant dense<0.000000e+00> : vector<2x32xf32>
    %60 = tpu.matmul %59, %3, %cst_20 {dimension_numbers = #tpu.dot_dimension_numbers<[1], [0], [0], [1], [0, 0, 1, 1], [], []>} : vector<2x32xf32>, vector<32x32xf32>, vector<2x32xf32> -> vector<2x32xf32>
    %61 = vector.broadcast %13 : vector<1x32xf32> to vector<2x32xf32>
    %62 = arith.addf %60, %61 : vector<2x32xf32>
    %63 = arith.addf %30, %62 : vector<2x32xf32>
    %cst_21 = arith.constant dense<0.000000e+00> : vector<2xf32>
    %64 = vector.multi_reduction <add>, %63, %cst_21 [1] : vector<2x32xf32> to vector<2xf32>
    %65 = vector.shape_cast %64 : vector<2xf32> to vector<2x1xf32>
    %cst_22 = arith.constant 3.200000e+01 : f32
    %66 = vector.broadcast %cst_22 : f32 to vector<2x1xf32>
    %67 = arith.divf %65, %66 : vector<2x1xf32>
    %68 = vector.broadcast %67 : vector<2x1xf32> to vector<2x32xf32>
    %69 = arith.subf %63, %68 : vector<2x32xf32>
    %70 = arith.mulf %69, %69 : vector<2x32xf32>
    %cst_23 = arith.constant dense<0.000000e+00> : vector<2xf32>
    %71 = vector.multi_reduction <add>, %70, %cst_23 [1] : vector<2x32xf32> to vector<2xf32>
    %72 = vector.shape_cast %71 : vector<2xf32> to vector<2x1xf32>
    %cst_24 = arith.constant 3.200000e+01 : f32
    %73 = vector.broadcast %cst_24 : f32 to vector<2x1xf32>
    %74 = arith.divf %72, %73 : vector<2x1xf32>
    %75 = vector.broadcast %67 : vector<2x1xf32> to vector<2x32xf32>
    %76 = arith.subf %63, %75 : vector<2x32xf32>
    %cst_25 = arith.constant 9.99999974E-6 : f32
    %77 = vector.broadcast %cst_25 : f32 to vector<2x1xf32>
    %78 = arith.addf %74, %77 : vector<2x1xf32>
    %79 = math.rsqrt %78 : vector<2x1xf32>
    %80 = vector.broadcast %79 : vector<2x1xf32> to vector<2x32xf32>
    %81 = arith.mulf %76, %80 : vector<2x32xf32>
    %82 = vector.broadcast %14 : vector<1x32xf32> to vector<2x32xf32>
    %83 = arith.mulf %81, %82 : vector<2x32xf32>
    %84 = vector.broadcast %15 : vector<1x32xf32> to vector<2x32xf32>
    %85 = arith.addf %83, %84 : vector<2x32xf32>
    %cst_26 = arith.constant dense<0.000000e+00> : vector<2x64xf32>
    %86 = tpu.matmul %85, %4, %cst_26 {dimension_numbers = #tpu.dot_dimension_numbers<[1], [0], [0], [1], [0, 0, 1, 1], [], []>} : vector<2x32xf32>, vector<32x64xf32>, vector<2x64xf32> -> vector<2x64xf32>
    %87 = vector.broadcast %16 : vector<1x64xf32> to vector<2x64xf32>
    %88 = arith.addf %86, %87 : vector<2x64xf32>
    %cst_27 = arith.constant 0.000000e+00 : f32
    %89 = vector.broadcast %cst_27 : f32 to vector<2x64xf32>
    %90 = arith.maximumf %88, %89 : vector<2x64xf32>
    %cst_28 = arith.constant dense<0.000000e+00> : vector<2x32xf32>
    %91 = tpu.matmul %90, %5, %cst_28 {dimension_numbers = #tpu.dot_dimension_numbers<[1], [0], [0], [1], [0, 0, 1, 1], [], []>} : vector<2x64xf32>, vector<64x32xf32>, vector<2x32xf32> -> vector<2x32xf32>
    %92 = vector.broadcast %17 : vector<1x32xf32> to vector<2x32xf32>
    %93 = arith.addf %91, %92 : vector<2x32xf32>
    %cst_29 = arith.constant 0.000000e+00 : f32
    %94 = vector.broadcast %cst_29 : f32 to vector<2x32xf32>
    %95 = arith.maximumf %93, %94 : vector<2x32xf32>
    %cst_30 = arith.constant dense<0.000000e+00> : vector<2x128xf32>
    %96 = tpu.matmul %95, %6, %cst_30 {dimension_numbers = #tpu.dot_dimension_numbers<[1], [0], [0], [1], [0, 0, 1, 1], [], []>} : vector<2x32xf32>, vector<32x128xf32>, vector<2x128xf32> -> vector<2x128xf32>
    %97 = vector.broadcast %18 : vector<1x128xf32> to vector<2x128xf32>
    %98 = arith.addf %96, %97 : vector<2x128xf32>
    %c0_31 = arith.constant 0 : index
    %c0_32 = arith.constant 0 : index
    %99 = vector.load %arg3[%c0_31, %c0_32] : memref<2x128xf32, #tpu.memory_space<vmem>>, vector<2x128xf32>
    tpu.vector_store %arg3[%c0_31, %c0_32], %98 {strides = array<i32>} : memref<2x128xf32, #tpu.memory_space<vmem>>, vector<2x128xf32>,
    return
  }
  func.func @transform_0(%arg0: i32) -> (i32, i32) {
    %c0_i32 = arith.constant 0 : i32
    %c0_i32_0 = arith.constant 0 : i32
    %c0_i32_1 = arith.constant 0 : i32
    return %c0_i32, %c0_i32_0 : i32, i32
  }
  func.func @transform_1(%arg0: i32) -> (i32, i32) {
    %c0_i32 = arith.constant 0 : i32
    %c0_i32_0 = arith.constant 0 : i32
    %c0_i32_1 = arith.constant 0 : i32
    return %c0_i32, %c0_i32_0 : i32, i32
  }
  func.func @transform_2(%arg0: i32) -> (i32, i32) {
    %c0_i32 = arith.constant 0 : i32
    %c0_i32_0 = arith.constant 0 : i32
    %c0_i32_1 = arith.constant 0 : i32
    return %c0_i32, %c0_i32_0 : i32, i32
  }
}

</mosaic_0001>

<bundles_post_ra>
// kernel: attention_value_forward.1
= control target key start
LH: loop header
LB: loop body
LE: loop exit
PB: predicated region body
PF: predicated region fallthrough
CT: control target
= control target key end

     0   :  { %7 = vsyncpa [#allocation3], 0  ;;  %s620_s0 = inlined_call_operand.hbm [shape: f32[16,16], index: 0, kind: input, shape index: {}]   ;;  %s621_s1 = inlined_call_operand.hbm [shape: f32[296,128], index: 1, kind: input, shape index: {}]   ;;  %s622_s2 = inlined_call_operand.vmem [shape: f32[2,128], index: 2, kind: output, shape index: {}]  }
   0x1   :  { %s13_s11 = sshll.u32 %s620_s0, 4  ;;  %s14_s11 = int_to_ptr.hbm [resolvable:$true] %s13_s11 }
   0x2   :  { %8 = vsyncpa [#allocation5], 0  ;;  %s558_s12 = smov [#allocation2]   ;;  %s26_s16 = sshll.u32 %s621_s1, 4  ;;  %s27_s16 = int_to_ptr.hbm [resolvable:$true] %s26_s16 }
   0x3   :  { %s15_s13 = sshll.u32 %s558_s12, 4  ;;  %s559_s17 = smov 128   ;;  %s16_s13 = int_to_ptr.vmem [resolvable:$true] %s15_s13 }
   0x4   :  { %s560_s18 = smov 8   ;;  %s561_s19 = smov [#allocation4]  }
   0x5   :  { %21 = dma.hbm_to_vmem [thread:$0]  %s14_s11, 256, %s16_s13, [#allocation3], %s559_s17, %s559_s17, %s560_s18  }
   0x6   :  { %s28_s20 = sshll.u32 %s561_s19, 4  ;;  %s29_s20 = int_to_ptr.vmem [resolvable:$true] %s28_s20 }
   0x7   :  { %34 = dma.hbm_to_vmem [thread:$0]  %s27_s16, 4736, %s29_s20, [#allocation5], %s559_s17, %s559_s17, %s560_s18  }
   0x8   :  { %554 = dma.done.wait [#allocation3], 256  }
   0x9   :  { %555 = vsyncadd [#allocation3], 4294967040 }
   0xa   :  { %556 = dma.done.wait [#allocation5], 4736  }
   0xb   :  { %557 = vsyncadd [#allocation5], 4294962560  ;;  %v44_v0 = vld [vmem:[#allocation4 + $0x8] sm:$0xff]  ;;  %v43_v1 = vld [vmem:[#allocation4] sm:$0xff]  ;;  %vm83_vm0 = vcmask 130048   ;;  %vm114_vm1 = vcmask 261120  }
   0xc   :  { %104 = vmatpush.msra.mxu0 %v44_v0  ;;  %v80_v2 = vld [vmem:[#allocation2] sm:$0xff]  ;;  %v52_v3 = vld [vmem:[#allocation4 + $0x48] sm:$0xff]  ;;  %v51_v4 = vld [vmem:[#allocation4 + $0x40] sm:$0xff]  ;;  %vm148_vm2 = vcmask 1040384   ;;  %s562_s0 = smov 96   ;;  %vm208_vm3 = vcmask 31744  }
   0xd   :  { %133 = vmatpush.msra.mxu1 %v52_v3  ;;  %v81_v5 = vld [vmem:[#allocation2 + $0x8] sm:$0xff]  ;;  %v49_v7 = vld [vmem:[#allocation4 + $0x30] sm:$0xff]  ;;  %v48_v8 = vld [vmem:[#allocation4 + $0x28] sm:$0xff]  ;;  %vm279_vm4 = vcmask 1043456   ;;  %vm333_vm13 = vcmask 1041409   ;;  %vm358_vm14 = vcmask 254976  }
   0xe   :  { %105 = vmatpush.msra.mxu0 %v43_v1  ;;  %v50_v6 = vld [vmem:[#allocation4 + $0x38] sm:$0xff]  ;;  %166 = vmatpush.msra.mxu2 %v48_v8  ;;  %v47_v9 = vld [vmem:[#allocation4 + $0x20] sm:$0xff]  ;;  %v45_v11 = vld [vmem:[#allocation4 + $0x10] sm:$0xff] }
   0xf   :  { %474 = vmatmul.msk.f32.vlgmr.msra.gmra.mxu0 %vm83_vm0, %v80_v2  ;;  %134 = vmatpush.msra.mxu1 %v51_v4  ;;  %v46_v10 = vld [vmem:[#allocation4 + $0x18] sm:$0xff]  ;;  %v76_v21 = vld [vmem:[#allocation4 + $0x108] sm:$0xff]  ;;  %v75_v22 = vld [vmem:[#allocation4 + $0x100] sm:$0xff] }
  0x10   :  { %167 = vmatpush.msra.mxu2 %v47_v9  ;;  %v585_v12 = vld [vmem:[#allocation4 + $0x118] sm:$0xff]  ;;  %197 = vmatpush.msra.mxu3 %v76_v21  ;;  %v73_v24 = vld [vmem:[#allocation4 + $0xf0] sm:$0xff] }
  0x11   :  { %135 = vmatpush.msra.mxu1 %v50_v6  ;;  %v82_v13 = vperm.slane %v585_v12, 0  ;;  %v74_v23 = vld [vmem:[#allocation4 + $0xf8] sm:$0xff]  ;;  %v113_v25 = vperm.slane %v585_v12, 2  ;;  %v150_v30 = vperm.slane %v585_v12, 1  ;;  %v77_v52 = vld [vmem:[#allocation4 + $0x110] sm:$0xf] }
  0x12   :  { %168 = vmatpush.msra.mxu2 %v46_v10  ;;  %198 = vmatpush.msra.mxu3 %v75_v22 }
  0x13   :  { %136 = vmatpush.msra.mxu1 %v49_v7 }
  0x14   :  { %169 = vmatpush.msra.mxu2 %v45_v11  ;;  %199 = vmatpush.msra.mxu3 %v74_v23 }
  0x16   :  { %200 = vmatpush.msra.mxu3 %v73_v24  ;;  %481 = vmatpush.msk.msrb.mxu2 %vm279_vm4, %v77_v52  ;;  %vm418_vm4 = vcmask 523264  }
  0x17   :  { %475 = vmatmul.msk.f32.gmra.mxu0 %vm83_vm0, %v81_v5 }
  0x8c   :  { %v107_v14 = vpop.f32.mrf.mxu0 }
  0x8d   :  { %v108_v15 = vadd.f32 %v107_v14, %v82_v13 }
  0x8f   :  { %476 = vmatmul.msk.f32.vlgmr.msra.gmra.mxu1 %vm114_vm1, %v108_v15  ;;  %v144_v18 = vrot.slane %v108_v15, 7 }
  0x94   :  { %v110_v16 = vpop.f32.mrf.mxu0 }
  0x95   :  { %v111_v17 = vadd.f32 %v110_v16, %v82_v13 }
  0x97   :  { %v146_v19 = vrot.slane %v111_v17, 6  ;;  %477 = vmatmul.msk.f32.gmra.mxu1 %vm114_vm1, %v111_v17 }
  0x99   :  { %v590_v20 = vsel %vm148_vm2, %v144_v18, %v146_v19 }
  0x9a   :  { %478 = vmatmul.msk.f32.vlgmr.msra.gmra.mxu2 %vm114_vm1, %v590_v20 }
 0x10c   :  { %v138_v26 = vpop.f32.mrf.mxu1 }
 0x10d   :  { %v139_v27 = vadd.f32 %v138_v26, %v113_v25 }
 0x10f   :  { %308 = vrot.lane.b32.xlu0 %v139_v27, %s562_s0 }
 0x114   :  { %v141_v28 = vpop.f32.mrf.mxu1 }
 0x115   :  { %v142_v29 = vadd.f32 %v141_v28, %v113_v25 }
 0x117   :  { %310 = vrot.lane.b32.xlu0 %v142_v29, %s562_s0 }
 0x11d   :  { %v171_v31 = vpop.f32.mrf.mxu2 }
 0x11e   :  { %v172_v32 = vadd.f32 %v171_v31, %v150_v30 }
 0x120   :  { %v174_v33 = vmul.f32 0.35355338, %v172_v32 }
 0x122   :  { %v175_v34 = vperm.slane %v174_v33, 0  ;;  %v176_v36 = vperm.slane %v174_v33, 1 }
 0x124   :  { %v177_v35 = vmul.f32 %v175_v34, %v139_v27  ;;  %v178_v37 = vmul.f32 %v176_v36, %v142_v29  ;;  %v55_v36 = vld [vmem:[#allocation4 + $0x60] sm:$0xff] }
 0x126   :  { %479 = vmatmul.msk.f32.vlgmr.msra.gmra.mxu3 %vm114_vm1, %v177_v35  ;;  %v56_v35 = vld [vmem:[#allocation4 + $0x68] sm:$0xff] }
 0x127   :  { %349 = vmatpush.msrb.mxu0 %v56_v35 }
 0x129   :  { %350 = vmatpush.msrb.mxu0 %v55_v36  ;;  %v390_v36 = vperm.slane %v585_v12, 5 }
 0x12e   :  { %480 = vmatmul.msk.f32.gmra.mxu3 %vm114_vm1, %v178_v37  ;;  %v54_v37 = vld [vmem:[#allocation4 + $0x58] sm:$0xff] }
 0x12f   :  { %351 = vmatpush.msrb.mxu0 %v54_v37 }
 0x1a9   :  { %v202_v38 = vpop.f32.mrf.mxu3 }
 0x1aa   :  { %v209_v39 = vsel %vm208_vm3, %v202_v38, -inf }
 0x1ab   :  { %v210_v40 = vrot.slane %v209_v39, 4 }
 0x1ad   :  { %v211_v41 = vmax.f32 %v209_v39, %v210_v40  ;;  %v309_v39 = vpop.permute.xlu0 %308 }
 0x1af   :  { %v212_v42 = vrot.slane %v211_v41, 2 }
 0x1b1   :  { %v213_v43 = vmax.f32 %v211_v41, %v212_v42  ;;  %v205_v44 = vpop.f32.mrf.mxu3 }
 0x1b2   :  { %v216_v45 = vsel %vm208_vm3, %v205_v44, -inf }
 0x1b3   :  { %v214_v46 = vrot.slane %v213_v43, 1  ;;  %v217_v47 = vrot.slane %v216_v45, 4 }
 0x1b5   :  { %v215_v48 = vmax.f32 %v213_v43, %v214_v46  ;;  %v218_v49 = vmax.f32 %v216_v45, %v217_v47  ;;  %v311_v45 = vpop.permute.xlu0 %310 }
 0x1b7   :  { %v223_v50 = vsub.f32 %v202_v38, %v215_v48  ;;  %v219_v51 = vrot.slane %v218_v49, 2  ;;  %v53_v38 = vld [vmem:[#allocation4 + $0x50] sm:$0xff] }
 0x1b8   :  { %352 = vmatpush.msrb.mxu0 %v53_v38 }
 0x1b9   :  { %v225_v53 = vmul.f32 1.442695, %v223_v50  ;;  %v220_v54 = vmax.f32 %v218_v49, %v219_v51 }
 0x1bb   :  { %494 = vpow2.f32 %v225_v53  ;;  %v221_v55 = vrot.slane %v220_v54, 1 }
 0x1bd   :  { %v222_v56 = vmax.f32 %v220_v54, %v221_v55 }
 0x1bf   :  { %v224_v57 = vsub.f32 %v205_v44, %v222_v56 }
 0x1c1   :  { %v495_v58 = vpop.eup %494  ;;  %v227_v59 = vmul.f32 1.442695, %v224_v57 }
 0x1c2   :  { %v229_v60 = vsel %vm208_vm3, %v495_v58, 0.0 }
 0x1c3   :  { %v230_v61 = vrot.slane %v229_v60, 4  ;;  %496 = vpow2.f32 %v227_v59 }
 0x1c5   :  { %v231_v62 = vadd.f32 %v230_v61, %v229_v60  ;;  %v330_v60 = vperm.slane %v585_v12, 3 }
 0x1c7   :  { %v232_v63 = vrot.slane %v231_v62, 2 }
 0x1c9   :  { %v497_v0 = vpop.eup %496  ;;  %v233_v1 = vadd.f32 %v232_v63, %v231_v62 }
 0x1ca   :  { %v236_v2 = vsel %vm208_vm3, %v497_v0, 0.0 }
 0x1cb   :  { %v234_v3 = vrot.slane %v233_v1, 1  ;;  %v237_v4 = vrot.slane %v236_v2, 4 }
 0x1cd   :  { %v235_v5 = vadd.f32 %v234_v3, %v233_v1  ;;  %v238_v6 = vadd.f32 %v237_v4, %v236_v2  ;;  %v563_v1 = vmov 32.0  }
 0x1cf   :  { %498 = vrcp.f32 %v235_v5  ;;  %v239_v7 = vrot.slane %v238_v6, 2  ;;  %v254_v15 = vand.u32 2147483648, %v235_v5  ;;  %v252_v17 = vand.u32 2147483647, %v235_v5 }
 0x1d0   :  { %vm248_vm6 = vweird.f32 %v235_v5 }
 0x1d1   :  { %v240_v8 = vadd.f32 %v239_v7, %v238_v6  ;;  %v255_v21 = vor.u32 1.1754944e-38, %v254_v15  ;;  %vm253_vm8 = vcmp.eq.f32.partialorder %v252_v17, 8.507059e+37  ;;  %v58_v15 = vld [vmem:[#allocation4 + $0x78] sm:$0xff]  ;;  %v68_v17 = vld [vmem:[#allocation4 + $0xc8] sm:$0xff] }
 0x1d2   :  { %430 = vmatpush.msrb.mxu3 %v68_v17 }
 0x1d3   :  { %v241_v9 = vrot.slane %v240_v8, 1 }
 0x1d5   :  { %v499_v10 = vpop.eup %498  ;;  %v242_v11 = vadd.f32 %v241_v9, %v240_v8 }
 0x1d6   :  { %v244_v13 = vmul.f32 %v499_v10, %v235_v5  ;;  %vm249_vm5 = vweird.f32 %v499_v10 }
 0x1d7   :  { %500 = vrcp.f32 %v242_v11  ;;  %vm250_vm7 = vmor %vm248_vm6, %vm249_vm5  ;;  %v269_v27 = vand.u32 2147483648, %v242_v11  ;;  %v267_v29 = vand.u32 2147483647, %v242_v11  ;;  %vm263_vm10 = vweird.f32 %v242_v11 }
 0x1d8   :  { %v245_v14 = vsub.f32 1.0, %v244_v13  ;;  %502 = vrcp.f32 %v563_v1 }
 0x1d9   :  { %v270_v31 = vor.u32 1.1754944e-38, %v269_v27  ;;  %vm268_vm12 = vcmp.eq.f32.partialorder %v267_v29, 8.507059e+37 }
 0x1da   :  { %v246_v16 = vmul.f32 %v499_v10, %v245_v14  ;;  %v59_v14 = vld [vmem:[#allocation4 + $0x80] sm:$0xff] }
 0x1dc   :  { %v247_v18 = vadd.f32 %v499_v10, %v246_v16  ;;  %v57_v16 = vld [vmem:[#allocation4 + $0x70] sm:$0xff] }
 0x1dd   :  { %v501_v19 = vpop.eup %500 }
 0x1de   :  { %v251_v22 = vsel %vm250_vm7, %v499_v10, %v247_v18  ;;  %v259_v23 = vmul.f32 %v501_v19, %v242_v11  ;;  %vm264_vm9 = vweird.f32 %v501_v19  ;;  %v503_v2 = vpop.eup %502  ;;  %v67_v18 = vld [vmem:[#allocation4 + $0xc0] sm:$0xff] }
 0x1df   :  { %v256_v24 = vsel %vm253_vm8, %v255_v21, %v251_v22  ;;  %vm265_vm11 = vmor %vm263_vm10, %vm264_vm9  ;;  %v363_v3 = vmul.f32 32.0, %v503_v2  ;;  %vm367_vm15 = vweird.f32 %v503_v2  ;;  %431 = vmatpush.msrb.mxu3 %v67_v18 }
 0x1e0   :  { %v257_v25 = vmul.f32 %v495_v58, %v256_v24  ;;  %v260_v26 = vsub.f32 1.0, %v259_v23  ;;  %v65_v23 = vld [vmem:[#allocation4 + $0xb0] sm:$0xff] }
 0x1e1   :  { %v364_v4 = vsub.f32 1.0, %v363_v3 }
 0x1e2   :  { %482 = vmatmul.msk.f32.vlgmr.msrb.gmra.mxu2 %vm208_vm3, %v257_v25  ;;  %v261_v28 = vmul.f32 %v501_v19, %v260_v26  ;;  %v64_v25 = vld [vmem:[#allocation4 + $0xa8] sm:$0xff]  ;;  %v63_v26 = vld [vmem:[#allocation4 + $0xa0] sm:$0xff] }
 0x1e3   :  { %v365_v5 = vmul.f32 %v503_v2, %v364_v4 }
 0x1e4   :  { %v262_v30 = vadd.f32 %v501_v19, %v261_v28 }
 0x1e5   :  { %v366_v6 = vadd.f32 %v503_v2, %v365_v5 }
 0x1e6   :  { %v266_v32 = vsel %vm265_vm11, %v501_v19, %v262_v30  ;;  %v66_v19 = vld [vmem:[#allocation4 + $0xb8] sm:$0xff] }
 0x1e7   :  { %v271_v33 = vsel %vm268_vm12, %v270_v31, %v266_v32  ;;  %v368_v7 = vsel %vm367_vm15, %v503_v2, %v366_v6  ;;  %432 = vmatpush.msrb.mxu3 %v66_v19 }
 0x1e8   :  { %v272_v34 = vmul.f32 %v497_v0, %v271_v33  ;;  %v388_v33 = vperm.slane %v585_v12, 4 }
 0x1e9   :  { %433 = vmatpush.msrb.mxu3 %v65_v23 }
 0x1ea   :  { %483 = vmatmul.msk.f32.gmra.mxu2 %vm208_vm3, %v272_v34 }
 0x1eb   :  { %434 = vmatpush.msrb.mxu3 %v64_v25 }
 0x1ed   :  { %435 = vmatpush.msrb.mxu3 %v63_v26 }
 0x265   :  { %v300_v40 = vpop.f32.mrf.mxu2 }
 0x266   :  { %v314_v41 = vmul.f32 %v309_v39, %v300_v40  ;;  %v62_v39 = vld [vmem:[#allocation4 + $0x98] sm:$0xff]  ;;  %v61_v40 = vld [vmem:[#allocation4 + $0x90] sm:$0xff] }
 0x267   :  { %436 = vmatpush.msrb.mxu3 %v62_v39 }
 0x268   :  { %v316_v42 = vsel %vm114_vm1, %v314_v41, 0.0  ;;  %v72_v41 = vld [vmem:[#allocation4 + $0xe8] sm:$0xff] }
 0x269   :  { %v317_v43 = vrot.slane %v316_v42, 4  ;;  %437 = vmatpush.msrb.mxu3 %v61_v40  ;;  %459 = vmatpush.msra.mxu0 %v72_v41 }
 0x26b   :  { %v318_v44 = vadd.f32 %v317_v43, %v316_v42  ;;  %v71_v42 = vld [vmem:[#allocation4 + $0xe0] sm:$0xff]  ;;  %v392_v43 = vperm.slane %v585_v12, 6 }
 0x26c   :  { %460 = vmatpush.msra.mxu0 %v71_v42 }
 0x26d   :  { %v303_v46 = vpop.f32.mrf.mxu2  ;;  %v319_v48 = vrot.slane %v318_v44, 2 }
 0x26e   :  { %v315_v47 = vmul.f32 %v311_v45, %v303_v46 }
 0x26f   :  { %v320_v51 = vadd.f32 %v319_v48, %v318_v44  ;;  %v69_v48 = vld [vmem:[#allocation4 + $0xd0] sm:$0xff] }
 0x270   :  { %v323_v49 = vsel %vm114_vm1, %v315_v47, 0.0  ;;  %v70_v47 = vld [vmem:[#allocation4 + $0xd8] sm:$0xff] }
 0x271   :  { %v324_v50 = vrot.slane %v323_v49, 4  ;;  %v321_v54 = vrot.slane %v320_v51, 1  ;;  %461 = vmatpush.msra.mxu0 %v70_v47 }
 0x273   :  { %v325_v52 = vadd.f32 %v324_v50, %v323_v49  ;;  %v322_v57 = vadd.f32 %v321_v54, %v320_v51  ;;  %462 = vmatpush.msra.mxu0 %v69_v48  ;;  %v417_v49 = vperm.slane %v585_v12, 7 }
 0x275   :  { %v326_v53 = vrot.slane %v325_v52, 2 }
 0x277   :  { %v327_v55 = vadd.f32 %v326_v53, %v325_v52  ;;  %v79_v53 = vld [vmem:[#allocation4 + $0x120] sm:$0xff] }
 0x278   :  { %v443_v54 = vperm.slane %v79_v53, 0 }
 0x279   :  { %v328_v56 = vrot.slane %v327_v55, 1 }
 0x27b   :  { %v329_v58 = vadd.f32 %v328_v56, %v327_v55 }
 0x27d   :  { %v334_v59 = vsel %vm333_vm13, %v329_v58, %v322_v57 }
 0x27e   :  { %484 = vmatmul.msk.f32.vlgmr.msrb.gmra.mxu0 %vm114_vm1, %v334_v59 }
 0x2fb   :  { %v354_v61 = vpop.f32.mrf.mxu0 }
 0x2fc   :  { %v355_v62 = vadd.f32 %v354_v61, %v330_v60 }
 0x2fe   :  { %v357_v63 = vadd.f32 %v355_v62, %v590_v20  ;;  %v60_v20 = vld [vmem:[#allocation4 + $0x88] sm:$0xff] }
 0x2ff   :  { %408 = vmatpush.msrb.mxu1 %v60_v20 }
 0x300   :  { %v359_v0 = vsel %vm358_vm14, %v357_v63, 0.0 }
 0x301   :  { %360 = vadd.xlane.f32.xlu1 %v359_v0  ;;  %409 = vmatpush.msrb.mxu1 %v59_v14 }
 0x303   :  { %410 = vmatpush.msrb.mxu1 %v58_v15 }
 0x305   :  { %411 = vmatpush.msrb.mxu1 %v57_v16 }
 0x374   :  { %v361_v8 = vpop.xlane.xlu1 %360 }
 0x375   :  { %v369_v9 = vmul.f32 %v368_v7, %v361_v8 }
 0x377   :  { %v370_v10 = vsub.f32 %v357_v63, %v369_v9 }
 0x379   :  { %v371_v11 = vmul.f32 %v370_v10, %v370_v10 }
 0x37b   :  { %v372_v13 = vsel %vm358_vm14, %v371_v11, 0.0 }
 0x37c   :  { %373 = vadd.xlane.f32.xlu1 %v372_v13 }
 0x3ef   :  { %v374_v21 = vpop.xlane.xlu1 %373 }
 0x3f0   :  { %v375_v22 = vmul.f32 %v374_v21, %v368_v7 }
 0x3f2   :  { %v376_v24 = vadd.f32 1e-05, %v375_v22 }
 0x3f4   :  { %504 = vrsqrt.f32 %v376_v24  ;;  %vm383_vm2 = vweird.f32 %v376_v24 }
 0x3fa   :  { %v505_v27 = vpop.eup %504 }
 0x3fb   :  { %v378_v28 = vmul.f32 %v505_v27, %v376_v24  ;;  %vm384_vm0 = vweird.f32 %v505_v27 }
 0x3fc   :  { %vm385_vm3 = vmor %vm383_vm2, %vm384_vm0 }
 0x3fd   :  { %v379_v29 = vmul.f32 %v505_v27, %v378_v28 }
 0x3ff   :  { %v380_v30 = vmul.f32 0.5, %v379_v29 }
 0x401   :  { %v381_v31 = vsub.f32 1.5, %v380_v30 }
 0x403   :  { %v382_v32 = vmul.f32 %v505_v27, %v381_v31 }
 0x405   :  { %v386_v34 = vsel %vm385_vm3, %v505_v27, %v382_v32 }
 0x406   :  { %v387_v35 = vmul.f32 %v386_v34, %v370_v10 }
 0x408   :  { %v389_v37 = vmul.f32 %v388_v33, %v387_v35 }
 0x40a   :  { %v391_v38 = vadd.f32 %v390_v36, %v389_v37 }
 0x40c   :  { %485 = vmatmul.msk.f32.vlgmr.msrb.gmra.mxu1 %vm114_vm1, %v391_v38 }
 0x489   :  { %v413_v44 = vpop.f32.mrf.mxu1 }
 0x48a   :  { %v414_v45 = vadd.f32 %v413_v44, %v392_v43 }
 0x48c   :  { %v416_v46 = vmax.f32 %v414_v45, 0.0 }
 0x48e   :  { %486 = vmatmul.msk.f32.vlgmr.msrb.gmra.mxu3 %vm418_vm4, %v416_v46 }
 0x511   :  { %v439_v50 = vpop.f32.mrf.mxu3 }
 0x512   :  { %v440_v51 = vadd.f32 %v439_v50, %v417_v49 }
 0x514   :  { %v442_v52 = vmax.f32 %v440_v51, 0.0 }
 0x516   :  { %487 = vmatmul.msk.f32.vlgmr.msra.gmra.mxu0 %vm114_vm1, %v442_v52 }
 0x593   :  { %v464_v55 = vpop.f32.mrf.mxu0 }
 0x594   :  { %v465_v56 = vadd.f32 %v464_v55, %v443_v54 }
 0x596   :  { %467 = vst [vmem:[%s622_s2] sm:$0x3] %v465_v56 }
 0x597   :  { %472 = vsyncpa [#allocation3], 1 }
 0x598   :  { %473 = vsyncpa [#allocation5], 1 }

</bundles_post_ra>
